<compile_context>
chip_gen: v7x
topology: tpu7x:2x2x1
jax: 0.10.0
libtpu: 0.0.40
codegen_flags: <defaults>
</compile_context>

<pallas_src>
import jax
import jax.numpy as jnp
from jax import lax
from jax.experimental import pallas as pl
from jax.experimental.pallas import tpu as pltpu

EPS = 1e-5
HIGHEST = jax.lax.Precision.HIGHEST


def _make_kernel(TB, H_use, W_use, W2o, P, n_even):
    S = W2o                        # H2 == 1 for this module -> S = W2
    col_start = (0, n_even, 1)     # reordered-column start for kw = 0, 1, 2

    def kernel(x_ref, w1_ref, b1_ref, w2_ref, b2_ref,
               wf1_ref, bf1_ref, wf2_ref, bf2_ref, out_ref):
        # conv_1x1 + BN2d + ReLU (BN scale pre-folded into w1): each pixel exactly once.
        h1 = jnp.dot(x_ref[...], w1_ref[...], preferred_element_type=jnp.float32)
        h1 = jnp.maximum(h1 + b1_ref[...], 0.0)                 # (H_use*W_use*TB, P)

        # conv_3x3 stride 2 + BN2d + ReLU: the 9 im2col taps are contiguous row slices of h1
        # (rows ordered (h, w, b) with even-first columns), fused into ONE big-K matmul.
        taps = []
        for kh in range(3):
            for kw in range(3):
                r0 = (kh * W_use + col_start[kw]) * TB
                taps.append(h1[r0:r0 + W2o * TB, :])            # (W2*TB, P), rows = (ow, b)
        h2 = jnp.dot(jnp.concatenate(taps, axis=-1), w2_ref[...],
                     preferred_element_type=jnp.float32)        # (W2*TB, 9P) x (9P, P)
        h2 = jnp.maximum(h2 + b2_ref[...], 0.0)                 # (W2*TB, P)

        # fc1 + BN1d + ReLU: the NCHW flatten is absorbed into the wf1 re-layout; the S
        # spatial slabs are contiguous row slices, fused into ONE matmul (K = S*P).
        fin = jnp.concatenate([h2[s * TB:(s + 1) * TB, :] for s in range(S)], axis=-1)
        hf = jnp.dot(fin, wf1_ref[...], preferred_element_type=jnp.float32)
        hf = jnp.maximum(hf + bf1_ref[...], 0.0)                # (TB, P)
        # TODO(synk): Dropout(p=0.5) is identity in eval mode; train-mode RNG mask not implemented.

        # fc2
        out_ref[...] = (jnp.dot(hf, wf2_ref[...], preferred_element_type=jnp.float32)
                        + bf2_ref[...])

    return kernel


def relative_rotation_classifier(x_nchw, params, *, batch_tile=128):
    """Eval-mode forward matching the PyTorch module. x_nchw: (B, C_in, H, W) float32."""
    (W1, b1, g1, be1, m1, v1,
     W2, b2, g2, be2, m2, v2,
     Wfc1, bfc1, gf, bef, mf, vf,
     Wfc2, bfc2) = params

    B, C, H, W = x_nchw.shape
    P = W1.shape[0]
    K = 3
    H2 = (H - K) // 2 + 1
    W2o = (W - K) // 2 + 1
    S = H2 * W2o
    cls = Wfc2.shape[0]
    assert H2 == 1 and Wfc1.shape[1] == P * S, "module requires a 1x4 map after conv_3x3"

    H_use = 2 * (H2 - 1) + K                         # input rows the 3x3 conv reads (=3)
    W_use = 2 * (W2o - 1) + K                        # input cols the 3x3 conv reads (=9)
    n_even = (W_use + 1) // 2

    # --- glue: NCHW -> NHWC, crop to the used window, even-first column reorder ---
    x_nhwc = jnp.transpose(x_nchw, (0, 2, 3, 1)).astype(jnp.float32)
    col_perm = jnp.array(list(range(0, W_use, 2)) + list(range(1, W_use, 2)), jnp.int32)
    x_r = x_nhwc[:, :H_use, :W_use, :][:, :, col_perm, :]          # (B, 3, 9, C)

    # --- batch tiling: per-tile rows ordered (h, w, b) so taps/slabs are contiguous ---
    TB = B if B <= batch_tile else batch_tile
    nt = (B + TB - 1) // TB
    Bp = nt * TB
    if Bp != B:
        x_r = jnp.pad(x_r, ((0, Bp - B), (0, 0), (0, 0), (0, 0)))
    rows = H_use * W_use * TB
    x_tiles = (x_r.reshape(nt, TB, H_use, W_use, C)
                  .transpose(0, 2, 3, 1, 4).reshape(nt, rows, C))

    # --- glue: eval-mode BatchNorm folded into the matmul weights / biases ---
    s1 = g1 / jnp.sqrt(v1 + EPS)
    w1f = jnp.transpose(W1[:, :, 0, 0], (1, 0)) * s1[None, :]      # (C, P)
    b1f = ((b1 - m1) * s1 + be1)[None, :]

    s2 = g2 / jnp.sqrt(v2 + EPS)
    w2f = jnp.transpose(W2, (2, 3, 1, 0)).reshape(K * K * P, P) * s2[None, :]   # (9P, P)
    b2f = ((b2 - m2) * s2 + be2)[None, :]

    sf = gf / jnp.sqrt(vf + EPS)
    # Wfc1[j, c*S + s] -> wf1f[s*P + c, j]  (absorbs the PyTorch NCHW flatten ordering)
    wf1f = (jnp.transpose(Wfc1.reshape(P, P, S), (2, 1, 0)).reshape(S * P, P)
            * sf[None, :])                                         # (S*P, P)
    bf1f = ((bfc1 - mf) * sf + bef)[None, :]

    wf2f = jnp.transpose(Wfc2, (1, 0))                             # (P, cls)
    bf2f = bfc2[None, :]

    kernel = _make_kernel(TB, H_use, W_use, W2o, P, n_even)
    resident = lambda a: pl.BlockSpec(a.shape, lambda i: (0, 0))   # weights stay VMEM-resident

    flops = 2 * Bp * (H_use * W_use * C * P + S * (K * K * P) * P + S * P * P + P * cls)
    bytes_accessed = 4 * (x_tiles.size + w1f.size + b1f.size + w2f.size + b2f.size
                          + wf1f.size + bf1f.size + wf2f.size + bf2f.size + Bp * cls)

    out = pl.pallas_call(
        kernel,
        out_shape=jax.ShapeDtypeStruct((nt, TB, cls), jnp.float32),
        grid=(nt,),
        in_specs=[pl.BlockSpec((None, rows, C), lambda i: (i, 0, 0)),
                  resident(w1f), resident(b1f), resident(w2f), resident(b2f),
                  resident(wf1f), resident(bf1f), resident(wf2f), resident(bf2f)],
        out_specs=pl.BlockSpec((None, TB, cls), lambda i: (i, 0, 0)),
        compiler_params=pltpu.CompilerParams(dimension_semantics=("parallel",)),
        cost_estimate=pl.CostEstimate(flops=flops, transcendentals=0,
                                      bytes_accessed=bytes_accessed),
    )(x_tiles, w1f, b1f, w2f, b2f, wf1f, bf1f, wf2f, bf2f)

    return out.reshape(Bp, cls)[:B]


def reference(x, params):
    """Pure-JAX eval-mode reference (matches PyTorch forward with BN in eval, dropout off)."""
    (W1, b1, g1, be1, m1, v1,
     W2, b2, g2, be2, m2, v2,
     Wfc1, bfc1, gf, bef, mf, vf,
     Wfc2, bfc2) = params
    dn = ('NCHW', 'OIHW', 'NCHW')
    y = lax.conv_general_dilated(x, W1, (1, 1), 'VALID', dimension_numbers=dn,
                                 precision=HIGHEST) + b1[None, :, None, None]
    y = (y - m1[None, :, None, None]) / jnp.sqrt(v1 + EPS)[None, :, None, None]
    y = y * g1[None, :, None, None] + be1[None, :, None, None]
    y = jnp.maximum(y, 0.0)
    y = lax.conv_general_dilated(y, W2, (2, 2), 'VALID', dimension_numbers=dn,
                                 precision=HIGHEST) + b2[None, :, None, None]
    y = (y - m2[None, :, None, None]) / jnp.sqrt(v2 + EPS)[None, :, None, None]
    y = y * g2[None, :, None, None] + be2[None, :, None, None]
    y = jnp.maximum(y, 0.0)
    y = y.reshape(y.shape[0], -1)                       # NCHW flatten, same as PyTorch
    y = jnp.dot(y, Wfc1.T, precision=HIGHEST) + bfc1
    y = (y - mf) / jnp.sqrt(vf + EPS) * gf + bef
    y = jnp.maximum(y, 0.0)
    y = jnp.dot(y, Wfc2.T, precision=HIGHEST) + bfc2
    return y


if __name__ == "__main__":
    # fc1 expects projection_dim * 1 * 4 features, so the stride-2 3x3 conv must output a
    # 1x4 map -> input spatial H=4, W=10.
    B, C_IN, H, W = 2, 8, 4, 10
    P, CLS = 32, 4

    key = jax.random.PRNGKey(0)
    ks = jax.random.split(key, 21)

    def nrm(k, shape, scale=0.1):
        return scale * jax.random.normal(k, shape, dtype=jnp.float32)

    W1 = nrm(ks[0], (P, C_IN, 1, 1)); b1 = nrm(ks[1], (P,))
    g1 = 1.0 + nrm(ks[2], (P,)); be1 = nrm(ks[3], (P,))
    m1 = nrm(ks[4], (P,)); v1 = jax.random.uniform(ks[5], (P,), jnp.float32, 0.5, 1.5)

    W2 = nrm(ks[6], (P, P, 3, 3)); b2 = nrm(ks[7], (P,))
    g2 = 1.0 + nrm(ks[8], (P,)); be2 = nrm(ks[9], (P,))
    m2 = nrm(ks[10], (P,)); v2 = jax.random.uniform(ks[11], (P,), jnp.float32, 0.5, 1.5)

    S = ((H - 3) // 2 + 1) * ((W - 3) // 2 + 1)   # == 4
    Wfc1 = nrm(ks[12], (P, P * S)); bfc1 = nrm(ks[13], (P,))
    gf = 1.0 + nrm(ks[14], (P,)); bef = nrm(ks[15], (P,))
    mf = nrm(ks[16], (P,)); vf = jax.random.uniform(ks[17], (P,), jnp.float32, 0.5, 1.5)

    Wfc2 = nrm(ks[18], (CLS, P)); bfc2 = nrm(ks[19], (CLS,))

    params = (W1, b1, g1, be1, m1, v1, W2, b2, g2, be2, m2, v2,
              Wfc1, bfc1, gf, bef, mf, vf, Wfc2, bfc2)

    x = jax.random.normal(ks[20], (B, C_IN, H, W), dtype=jnp.float32)

    out = relative_rotation_classifier(x, params)
    out = jax.block_until_ready(out)
    ref = reference(x, params)

    assert out.shape == (B, CLS)
    # Kernel uses default MXU precision; reference is HIGHEST -> loose tolerance.
    assert jnp.allclose(out, ref, atol=2e-2, rtol=2e-2), (out, ref)
    print("KERNEL_OK")
</pallas_src>

<mosaic_0001>
module attributes {stable_mosaic.version = 11 : i64} {
  func.func @kernel(%arg0: i32, %arg1: memref<1x54x8xf32, #tpu.memory_space<vmem>>, %arg2: memref<8x32xf32, #tpu.memory_space<vmem>>, %arg3: memref<1x32xf32, #tpu.memory_space<vmem>>, %arg4: memref<288x32xf32, #tpu.memory_space<vmem>>, %arg5: memref<1x32xf32, #tpu.memory_space<vmem>>, %arg6: memref<128x32xf32, #tpu.memory_space<vmem>>, %arg7: memref<1x32xf32, #tpu.memory_space<vmem>>, %arg8: memref<32x4xf32, #tpu.memory_space<vmem>>, %arg9: memref<1x4xf32, #tpu.memory_space<vmem>>, %arg10: memref<1x2x4xf32, #tpu.memory_space<vmem>>) attributes {dimension_semantics = [#tpu.dimension_semantics<parallel>], iteration_bounds = array<i64: 1>, scalar_prefetch = 0 : i64, scratch_operands = 0 : i64, tpu.core_type = #tpu.core_type<tc>, window_params = [{transform_indices = @transform_0, window_bounds = array<i64: 1, 54, 8>}, {pipeline_mode = #tpu.pipeline_mode<synchronous>, transform_indices = @transform_1, window_bounds = array<i64: 8, 32>}, {pipeline_mode = #tpu.pipeline_mode<synchronous>, transform_indices = @transform_2, window_bounds = array<i64: 1, 32>}, {pipeline_mode = #tpu.pipeline_mode<synchronous>, transform_indices = @transform_3, window_bounds = array<i64: 288, 32>}, {pipeline_mode = #tpu.pipeline_mode<synchronous>, transform_indices = @transform_4, window_bounds = array<i64: 1, 32>}, {pipeline_mode = #tpu.pipeline_mode<synchronous>, transform_indices = @transform_5, window_bounds = array<i64: 128, 32>}, {pipeline_mode = #tpu.pipeline_mode<synchronous>, transform_indices = @transform_6, window_bounds = array<i64: 1, 32>}, {pipeline_mode = #tpu.pipeline_mode<synchronous>, transform_indices = @transform_7, window_bounds = array<i64: 32, 4>}, {pipeline_mode = #tpu.pipeline_mode<synchronous>, transform_indices = @transform_8, window_bounds = array<i64: 1, 4>}, {transform_indices = @transform_9, window_bounds = array<i64: 1, 2, 4>}]} {
    %c0 = arith.constant 0 : index
    %c0_0 = arith.constant 0 : index
    %c0_1 = arith.constant 0 : index
    %0 = vector.load %arg1[%c0, %c0_0, %c0_1] : memref<1x54x8xf32, #tpu.memory_space<vmem>>, vector<1x54x8xf32>
    %1 = vector.shape_cast %0 : vector<1x54x8xf32> to vector<54x8xf32>
    %c0_2 = arith.constant 0 : index
    %c0_3 = arith.constant 0 : index
    %2 = vector.load %arg2[%c0_2, %c0_3] : memref<8x32xf32, #tpu.memory_space<vmem>>, vector<8x32xf32>
    %cst = arith.constant dense<0.000000e+00> : vector<54x32xf32>
    %3 = tpu.matmul %1, %2, %cst {dimension_numbers = #tpu.dot_dimension_numbers<[1], [0], [0], [1], [0, 0, 1, 1], [], []>} : vector<54x8xf32>, vector<8x32xf32>, vector<54x32xf32> -> vector<54x32xf32>
    %c0_4 = arith.constant 0 : index
    %c0_5 = arith.constant 0 : index
    %4 = vector.load %arg3[%c0_4, %c0_5] : memref<1x32xf32, #tpu.memory_space<vmem>>, vector<1x32xf32>
    %5 = vector.broadcast %4 : vector<1x32xf32> to vector<54x32xf32>
    %6 = arith.addf %3, %5 : vector<54x32xf32>
    %cst_6 = arith.constant 0.000000e+00 : f32
    %7 = vector.broadcast %cst_6 : f32 to vector<54x32xf32>
    %8 = arith.maximumf %6, %7 : vector<54x32xf32>
    %9 = vector.extract_strided_slice %8 {offsets = [0, 0], sizes = [8, 32], strides = [1, 1]} : vector<54x32xf32> to vector<8x32xf32>
    %10 = vector.extract_strided_slice %8 {offsets = [10, 0], sizes = [8, 32], strides = [1, 1]} : vector<54x32xf32> to vector<8x32xf32>
    %11 = vector.extract_strided_slice %8 {offsets = [2, 0], sizes = [8, 32], strides = [1, 1]} : vector<54x32xf32> to vector<8x32xf32>
    %12 = vector.extract_strided_slice %8 {offsets = [18, 0], sizes = [8, 32], strides = [1, 1]} : vector<54x32xf32> to vector<8x32xf32>
    %13 = vector.extract_strided_slice %8 {offsets = [28, 0], sizes = [8, 32], strides = [1, 1]} : vector<54x32xf32> to vector<8x32xf32>
    %14 = vector.extract_strided_slice %8 {offsets = [20, 0], sizes = [8, 32], strides = [1, 1]} : vector<54x32xf32> to vector<8x32xf32>
    %15 = vector.extract_strided_slice %8 {offsets = [36, 0], sizes = [8, 32], strides = [1, 1]} : vector<54x32xf32> to vector<8x32xf32>
    %16 = vector.extract_strided_slice %8 {offsets = [46, 0], sizes = [8, 32], strides = [1, 1]} : vector<54x32xf32> to vector<8x32xf32>
    %17 = vector.extract_strided_slice %8 {offsets = [38, 0], sizes = [8, 32], strides = [1, 1]} : vector<54x32xf32> to vector<8x32xf32>
    %18 = tpu.concatenate %9, %10, %11, %12, %13, %14, %15, %16, %17 in 1 : vector<8x32xf32>, vector<8x32xf32>, vector<8x32xf32>, vector<8x32xf32>, vector<8x32xf32>, vector<8x32xf32>, vector<8x32xf32>, vector<8x32xf32>, vector<8x32xf32> -> vector<8x288xf32>
    %c0_7 = arith.constant 0 : index
    %c0_8 = arith.constant 0 : index
    %19 = vector.load %arg4[%c0_7, %c0_8] : memref<288x32xf32, #tpu.memory_space<vmem>>, vector<288x32xf32>
    %cst_9 = arith.constant dense<0.000000e+00> : vector<8x32xf32>
    %20 = tpu.matmul %18, %19, %cst_9 {dimension_numbers = #tpu.dot_dimension_numbers<[1], [0], [0], [1], [0, 0, 1, 1], [], []>} : vector<8x288xf32>, vector<288x32xf32>, vector<8x32xf32> -> vector<8x32xf32>
    %c0_10 = arith.constant 0 : index
    %c0_11 = arith.constant 0 : index
    %21 = vector.load %arg5[%c0_10, %c0_11] : memref<1x32xf32, #tpu.memory_space<vmem>>, vector<1x32xf32>
    %22 = vector.broadcast %21 : vector<1x32xf32> to vector<8x32xf32>
    %23 = arith.addf %20, %22 : vector<8x32xf32>
    %cst_12 = arith.constant 0.000000e+00 : f32
    %24 = vector.broadcast %cst_12 : f32 to vector<8x32xf32>
    %25 = arith.maximumf %23, %24 : vector<8x32xf32>
    %26 = vector.extract_strided_slice %25 {offsets = [0, 0], sizes = [2, 32], strides = [1, 1]} : vector<8x32xf32> to vector<2x32xf32>
    %27 = vector.extract_strided_slice %25 {offsets = [2, 0], sizes = [2, 32], strides = [1, 1]} : vector<8x32xf32> to vector<2x32xf32>
    %28 = vector.extract_strided_slice %25 {offsets = [4, 0], sizes = [2, 32], strides = [1, 1]} : vector<8x32xf32> to vector<2x32xf32>
    %29 = vector.extract_strided_slice %25 {offsets = [6, 0], sizes = [2, 32], strides = [1, 1]} : vector<8x32xf32> to vector<2x32xf32>
    %30 = tpu.concatenate %26, %27, %28, %29 in 1 : vector<2x32xf32>, vector<2x32xf32>, vector<2x32xf32>, vector<2x32xf32> -> vector<2x128xf32>
    %c0_13 = arith.constant 0 : index
    %c0_14 = arith.constant 0 : index
    %31 = vector.load %arg6[%c0_13, %c0_14] : memref<128x32xf32, #tpu.memory_space<vmem>>, vector<128x32xf32>
    %cst_15 = arith.constant dense<0.000000e+00> : vector<2x32xf32>
    %32 = tpu.matmul %30, %31, %cst_15 {dimension_numbers = #tpu.dot_dimension_numbers<[1], [0], [0], [1], [0, 0, 1, 1], [], []>} : vector<2x128xf32>, vector<128x32xf32>, vector<2x32xf32> -> vector<2x32xf32>
    %c0_16 = arith.constant 0 : index
    %c0_17 = arith.constant 0 : index
    %33 = vector.load %arg7[%c0_16, %c0_17] : memref<1x32xf32, #tpu.memory_space<vmem>>, vector<1x32xf32>
    %34 = vector.broadcast %33 : vector<1x32xf32> to vector<2x32xf32>
    %35 = arith.addf %32, %34 : vector<2x32xf32>
    %cst_18 = arith.constant 0.000000e+00 : f32
    %36 = vector.broadcast %cst_18 : f32 to vector<2x32xf32>
    %37 = arith.maximumf %35, %36 : vector<2x32xf32>
    %c0_19 = arith.constant 0 : index
    %c0_20 = arith.constant 0 : index
    %38 = vector.load %arg8[%c0_19, %c0_20] : memref<32x4xf32, #tpu.memory_space<vmem>>, vector<32x4xf32>
    %cst_21 = arith.constant dense<0.000000e+00> : vector<2x4xf32>
    %39 = tpu.matmul %37, %38, %cst_21 {dimension_numbers = #tpu.dot_dimension_numbers<[1], [0], [0], [1], [0, 0, 1, 1], [], []>} : vector<2x32xf32>, vector<32x4xf32>, vector<2x4xf32> -> vector<2x4xf32>
    %c0_22 = arith.constant 0 : index
    %c0_23 = arith.constant 0 : index
    %40 = vector.load %arg9[%c0_22, %c0_23] : memref<1x4xf32, #tpu.memory_space<vmem>>, vector<1x4xf32>
    %41 = vector.broadcast %40 : vector<1x4xf32> to vector<2x4xf32>
    %42 = arith.addf %39, %41 : vector<2x4xf32>
    %c0_24 = arith.constant 0 : index
    %c0_25 = arith.constant 0 : index
    %c0_26 = arith.constant 0 : index
    %43 = vector.load %arg10[%c0_24, %c0_25, %c0_26] : memref<1x2x4xf32, #tpu.memory_space<vmem>>, vector<1x2x4xf32>
    %44 = vector.shape_cast %43 : vector<1x2x4xf32> to vector<2x4xf32>
    %45 = vector.shape_cast %42 : vector<2x4xf32> to vector<1x2x4xf32>
    tpu.vector_store %arg10[%c0_24, %c0_25, %c0_26], %45 {strides = array<i32>} : memref<1x2x4xf32, #tpu.memory_space<vmem>>, vector<1x2x4xf32>,
    return
  }
  func.func @transform_0(%arg0: i32) -> (i32, i32, i32) {
    %c0_i32 = arith.constant 0 : i32
    %c0_i32_0 = arith.constant 0 : i32
    %c0_i32_1 = arith.constant 0 : i32
    return %arg0, %c0_i32, %c0_i32_0 : i32, i32, i32
  }
  func.func @transform_1(%arg0: i32) -> (i32, i32) {
    %c0_i32 = arith.constant 0 : i32
    %c0_i32_0 = arith.constant 0 : i32
    %c0_i32_1 = arith.constant 0 : i32
    return %c0_i32, %c0_i32_0 : i32, i32
  }
  func.func @transform_2(%arg0: i32) -> (i32, i32) {
    %c0_i32 = arith.constant 0 : i32
    %c0_i32_0 = arith.constant 0 : i32
    %c0_i32_1 = arith.constant 0 : i32
    return %c0_i32, %c0_i32_0 : i32, i32
  }
  func.func @transform_3(%arg0: i32) -> (i32, i32) {
    %c0_i32 = arith.constant 0 : i32
    %c0_i32_0 = arith.constant 0 : i32
    %c0_i32_1 = arith.constant 0 : i32
    return %c0_i32, %c0_i32_0 : i32, i32
  }
  func.func @transform_4(%arg0: i32) -> (i32, i32) {
    %c0_i32 = arith.constant 0 : i32
    %c0_i32_0 = arith.constant 0 : i32
    %c0_i32_1 = arith.constant 0 : i32
    return %c0_i32, %c0_i32_0 : i32, i32
  }
  func.func @transform_5(%arg0: i32) -> (i32, i32) {
    %c0_i32 = arith.constant 0 : i32
    %c0_i32_0 = arith.constant 0 : i32
    %c0_i32_1 = arith.constant 0 : i32
    return %c0_i32, %c0_i32_0 : i32, i32
  }
  func.func @transform_6(%arg0: i32) -> (i32, i32) {
    %c0_i32 = arith.constant 0 : i32
    %c0_i32_0 = arith.constant 0 : i32
    %c0_i32_1 = arith.constant 0 : i32
    return %c0_i32, %c0_i32_0 : i32, i32
  }
  func.func @transform_7(%arg0: i32) -> (i32, i32) {
    %c0_i32 = arith.constant 0 : i32
    %c0_i32_0 = arith.constant 0 : i32
    %c0_i32_1 = arith.constant 0 : i32
    return %c0_i32, %c0_i32_0 : i32, i32
  }
  func.func @transform_8(%arg0: i32) -> (i32, i32) {
    %c0_i32 = arith.constant 0 : i32
    %c0_i32_0 = arith.constant 0 : i32
    %c0_i32_1 = arith.constant 0 : i32
    return %c0_i32, %c0_i32_0 : i32, i32
  }
  func.func @transform_9(%arg0: i32) -> (i32, i32, i32) {
    %c0_i32 = arith.constant 0 : i32
    %c0_i32_0 = arith.constant 0 : i32
    %c0_i32_1 = arith.constant 0 : i32
    return %arg0, %c0_i32, %c0_i32_0 : i32, i32, i32
  }
}

</mosaic_0001>

<bundles_post_ra>
// kernel: tpu_custom_call.1
= control target key start
LH: loop header
LB: loop body
LE: loop exit
PB: predicated region body
PF: predicated region fallthrough
CT: control target
= control target key end

     0   :  { %vm48_vm0 = vcmask 64512   ;;  %v907_v2 = vmov 0.0   ;;  %vm908_vm1 = vmmov 0   ;;  %s1257_s0 = inlined_call_operand.vmem [shape: f32[1,54,8], index: 0, kind: input, shape index: {}]   ;;  %s1258_s1 = inlined_call_operand.vmem [shape: f32[8,32], index: 1, kind: input, shape index: {}]   ;;  %s1259_s2 = inlined_call_operand.vmem [shape: f32[1,32], index: 2, kind: input, shape index: {}]   ;;  %s1260_s3 = inlined_call_operand.vmem [shape: f32[288,32], index: 3, kind: input, shape index: {}]   ;;  %s1261_s4 = inlined_call_operand.vmem [shape: f32[1,32], index: 4, kind: input, shape index: {}]   ;;  %s1262_s5 = inlined_call_operand.vmem [shape: f32[128,32], index: 5, kind: input, shape index: {}]   ;;  %s1263_s6 = inlined_call_operand.vmem [shape: f32[1,32], index: 6, kind: input, shape index: {}]   ;;  %s1264_s7 = inlined_call_operand.vmem [shape: f32[32,4], index: 7, kind: input, shape index: {}]   ;;  %s1265_s8 = inlined_call_operand.vmem [shape: f32[1,4], index: 8, kind: input, shape index: {}]   ;;  %s1266_s9 = inlined_call_operand.hbm [shape: f32[1,2,4], index: 9, kind: output, shape index: {}]  }
   0x1   :  { %v40_v0 = vld [vmem:[%s1258_s1] sm:$0xff]  ;;  %713 = vmatprep.subr.mxu1 %v907_v2  ;;  %715 = vmatprep.mubr.msk.f32.mxu1 %vm908_vm1, %v907_v2 }
   0x2   :  { %v33_v1 = vld [vmem:[%s1257_s0] sm:$0xff]  ;;  %714 = vmatpush3.msra.mxu1 %v40_v0  ;;  %744 = vmatprep.mubr.msk.f32.mxu0 %vm908_vm1, %v907_v2 }
   0x3   :  { %716 = vmatmul.mubr.msk.f32.vlgmr.msra.gmra.mrb[0].mxu1 %vm48_vm0, %v33_v1 }
   0x4   :  { %14 = vsyncpa [#allocation3], 0  ;;  %718 = vmatprep.mubr.msk.f32.mxu1 %vm908_vm1, %v907_v2  ;;  %v34_v3 = vld [vmem:[%s1257_s0 + $0x8] sm:$0xff]  ;;  %v35_v4 = vld [vmem:[%s1257_s0 + $0x10] sm:$0xff]  ;;  %v909_v12 = vmov 0.0|0.0   ;;  %vm179_vm2 = vcmask 1045504  }
   0x5   :  { %v36_v5 = vld [vmem:[%s1257_s0 + $0x18] sm:$0xff]  ;;  %v37_v6 = vld [vmem:[%s1257_s0 + $0x20] sm:$0xff]  ;;  %v38_v7 = vld [vmem:[%s1257_s0 + $0x28] sm:$0xff]  ;;  %825 = vmatprep.subr.bf16.mxu0 %v909_v12  ;;  %vm199_vm3 = vcmask 1043456   ;;  %s910_s27 = smov 32   ;;  %vm216_vm4 = vcmask 1041408  }
   0x6   :  { %v39_v8 = vld [vmem:[%s1257_s0 + $0x30] sm:$0x3f]  ;;  %v266_v9 = vld [vmem:[%s1260_s3 + $0x100] sm:$0xff]  ;;  %v267_v10 = vld [vmem:[%s1260_s3 + $0x108] sm:$0xff]  ;;  %vm225_vm5 = vcmask 261120   ;;  %s912_s28 = smov 96  }
   0x7   :  { %719 = vmatmul.mubr.msk.f32.gmra.mrb[2].mxu1 %vm48_vm0, %v34_v3  ;;  %v826_v11 = vpack.c.bf16 %v267_v10, %v266_v9  ;;  %v268_v13 = vld [vmem:[%s1260_s3 + $0x110] sm:$0xff]  ;;  %v269_v14 = vld [vmem:[%s1260_s3 + $0x118] sm:$0xff]  ;;  %v250_v16 = vld [vmem:[%s1260_s3 + $0x80] sm:$0xff]  ;;  %vm227_vm6 = vcmask 523264   ;;  %vm229_vm7 = vcmask 785408   ;;  %s913_s25 = smov [#allocation2]  }
   0x8   :  { %721 = vmatprep.mubr.msk.f32.mxu1 %vm908_vm1, %v907_v2  ;;  %v829_v15 = vpack.c.bf16 %v269_v14, %v268_v13  ;;  %v251_v17 = vld [vmem:[%s1260_s3 + $0x88] sm:$0xff]  ;;  %v234_v18 = vld [vmem:[%s1260_s3] sm:$0xff]  ;;  %v252_v21 = vld [vmem:[%s1260_s3 + $0x90] sm:$0xff]  ;;  %s622_s26 = sshll.u32 %s913_s25, 4  ;;  %vm614_vm8 = vcmask 25600   ;;  %s623_s26 = int_to_ptr.vmem [resolvable:$true] %s622_s26 }
   0x9   :  { %827 = vmatpush3.bf16.msra.mxu0 %v826_v11  ;;  %v793_v19 = vpack.c.bf16 %v251_v17, %v250_v16  ;;  %v235_v20 = vld [vmem:[%s1260_s3 + $0x8] sm:$0xff]  ;;  %v253_v22 = vld [vmem:[%s1260_s3 + $0x98] sm:$0xff]  ;;  %v236_v25 = vld [vmem:[%s1260_s3 + $0x10] sm:$0xff]  ;;  %p888_p1 = scmp.lt.s32.totalorder %s623_s26, %s623_s26 }
   0xa   :  { %828 = vmatprep.subr.bf16.mxu0 %v909_v12  ;;  %v795_v23 = vpack.c.bf16 %v235_v20, %v234_v18  ;;  %v797_v24 = vpack.c.bf16 %v253_v22, %v252_v21  ;;  %v237_v26 = vld [vmem:[%s1260_s3 + $0x18] sm:$0xff]  ;;  %v254_v27 = vld [vmem:[%s1260_s3 + $0xa0] sm:$0xff]  ;;  %v255_v28 = vld [vmem:[%s1260_s3 + $0xa8] sm:$0xff] }
   0xb   :  { %722 = vmatmul.mubr.msk.f32.gmra.mrb[4].mxu1 %vm48_vm0, %v35_v4  ;;  %794 = vmatprep.subr.bf16.mxu1 %v793_v19  ;;  %v799_v29 = vpack.c.bf16 %v237_v26, %v236_v25  ;;  %v801_v30 = vpack.c.bf16 %v255_v28, %v254_v27  ;;  %v238_v31 = vld [vmem:[%s1260_s3 + $0x20] sm:$0xff]  ;;  %v239_v32 = vld [vmem:[%s1260_s3 + $0x28] sm:$0xff]  ;;  %v256_v33 = vld [vmem:[%s1260_s3 + $0xb0] sm:$0xff] }
   0xc   :  { %724 = vmatprep.mubr.msk.f32.mxu1 %vm908_vm1, %v907_v2  ;;  %796 = vmatpush3.bf16.msra.mxu1 %v795_v23  ;;  %v257_v34 = vld [vmem:[%s1260_s3 + $0xb8] sm:$0xff]  ;;  %v803_v35 = vpack.c.bf16 %v239_v32, %v238_v31  ;;  %v240_v37 = vld [vmem:[%s1260_s3 + $0x30] sm:$0xff]  ;;  %v1078_v42 = vld [vmem:[%s1259_s2] ss:$0 sm:$0xff] }
   0xd   :  { %830 = vmatpush3.bf16.msra.mxu0 %v829_v15  ;;  %798 = vmatprep.subr.bf16.mxu1 %v797_v24  ;;  %v805_v36 = vpack.c.bf16 %v257_v34, %v256_v33  ;;  %v241_v38 = vld [vmem:[%s1260_s3 + $0x38] sm:$0xff]  ;;  %v258_v46 = vld [vmem:[%s1260_s3 + $0xc0] sm:$0xff]  ;;  %v259_v47 = vld [vmem:[%s1260_s3 + $0xc8] sm:$0xff] }
   0xe   :  { %831 = vmatprep.subr.bf16.mxu0 %v909_v12  ;;  %v807_v39 = vpack.c.bf16 %v241_v38, %v240_v37  ;;  %v809_v48 = vpack.c.bf16 %v259_v47, %v258_v46  ;;  %v242_v49 = vld [vmem:[%s1260_s3 + $0x40] sm:$0xff]  ;;  %v243_v50 = vld [vmem:[%s1260_s3 + $0x48] sm:$0xff]  ;;  %v260_v56 = vld [vmem:[%s1260_s3 + $0xd0] sm:$0xff] }
   0xf   :  { %725 = vmatmul.mubr.msk.f32.gmra.mrb[6].mxu1 %vm48_vm0, %v36_v5  ;;  %v811_v52 = vpack.c.bf16 %v243_v50, %v242_v49  ;;  %v261_v57 = vld [vmem:[%s1260_s3 + $0xd8] sm:$0xff]  ;;  %v244_v60 = vld [vmem:[%s1260_s3 + $0x50] sm:$0xff]  ;;  %v262_v5 = vld [vmem:[%s1260_s3 + $0xe0] sm:$0xff] }
  0x10   :  { %727 = vmatprep.mubr.msk.f32.mxu1 %vm908_vm1, %v907_v2  ;;  %800 = vmatpush3.bf16.msra.mxu1 %v799_v29  ;;  %v813_v59 = vpack.c.bf16 %v261_v57, %v260_v56  ;;  %v245_v61 = vld [vmem:[%s1260_s3 + $0x58] sm:$0xff]  ;;  %v246_v10 = vld [vmem:[%s1260_s3 + $0x60] sm:$0xff]  ;;  %v247_v11 = vld [vmem:[%s1260_s3 + $0x68] sm:$0xff] }
  0x11   :  { %802 = vmatprep.subr.bf16.mxu1 %v801_v30  ;;  %v815_v63 = vpack.c.bf16 %v245_v61, %v244_v60  ;;  %v819_v15 = vpack.c.bf16 %v247_v11, %v246_v10  ;;  %v264_v21 = vld [vmem:[%s1260_s3 + $0xf0] sm:$0xff]  ;;  %v265_v22 = vld [vmem:[%s1260_s3 + $0xf8] sm:$0xff] }
  0x12   :  { %v821_v26 = vpack.c.bf16 %v265_v22, %v264_v21  ;;  %v248_v27 = vld [vmem:[%s1260_s3 + $0x70] sm:$0xff]  ;;  %v249_v28 = vld [vmem:[%s1260_s3 + $0x78] sm:$0xff] }
  0x13   :  { %728 = vmatmul.mubr.msk.f32.gmra.mrb[8].mxu1 %vm48_vm0, %v37_v6  ;;  %v263_v6 = vld [vmem:[%s1260_s3 + $0xe8] sm:$0xff]  ;;  %v823_v32 = vpack.c.bf16 %v249_v28, %v248_v27  ;;  %s911_s3 = smov 64   ;;  %v439_v11 = vld [vmem:[%s1262_s5 + $0x18] sm:$0xff]  ;;  %v446_v22 = vld [vmem:[%s1262_s5 + $0x50] sm:$0xff] }
  0x14   :  { %730 = vmatprep.mubr.msk.f32.mxu1 %vm908_vm1, %v907_v2  ;;  %804 = vmatpush3.bf16.msra.mxu1 %v803_v35  ;;  %v817_v9 = vpack.c.bf16 %v263_v6, %v262_v5  ;;  %v450_v28 = vld [vmem:[%s1262_s5 + $0x70] sm:$0xff] }
  0x15   :  { %806 = vmatprep.subr.bf16.mxu1 %v805_v36 }
  0x17   :  { %731 = vmatmul.mubr.msk.f32.gmra.mrb[10].mxu1 %vm48_vm0, %v38_v7 }
  0x18   :  { %733 = vmatprep.mubr.msk.f32.mxu1 %vm908_vm1, %v907_v2  ;;  %808 = vmatpush3.bf16.msra.mxu1 %v807_v39 }
  0x19   :  { %810 = vmatprep.subr.bf16.mxu1 %v809_v48 }
  0x1b   :  { %734 = vmatmul.mubr.msk.f32.gmra.mrb[12].mxu1 %vm48_vm0, %v39_v8 }
  0x1c   :  { %812 = vmatpush3.bf16.msra.mxu1 %v811_v52 }
  0x1d   :  { %814 = vmatprep.subr.bf16.mxu1 %v813_v59 }
  0x20   :  { %816 = vmatpush3.bf16.msra.mxu1 %v815_v63 }
  0x21   :  { %818 = vmatprep.subr.bf16.mxu1 %v817_v9  ;;  %v438_v9 = vld [vmem:[%s1262_s5 + $0x10] sm:$0xff] }
  0x24   :  { %820 = vmatpush3.bf16.msra.mxu1 %v819_v15 }
  0x25   :  { %822 = vmatprep.subr.bf16.mxu1 %v821_v26  ;;  %v449_v26 = vld [vmem:[%s1262_s5 + $0x68] sm:$0xff] }
  0x28   :  { %824 = vmatpush3.bf16.msra.mxu1 %v823_v32  ;;  %v638_v32 = vld [vmem:[%s1261_s4] ss:$0 sm:$0xff] }
  0x29   :  { %855 = vmatprep.subr.bf16.mxu1 %v909_v12 }
  0xd6   :  { %v136_v40 = vpop.f32.mrb[0].mxu1 }
  0xd7   :  { %v717_v41 = vpop.f32.mrb[1].mxu1  ;;  %v1121_v13 = vadd.f32 %v1078_v42, %v136_v40 }
  0xd9   :  { %v170_v29 = vmax.f32 %v1121_v13, 0.0  ;;  %v440_v13 = vld [vmem:[%s1262_s5 + $0x20] sm:$0xff] }
  0xda   :  { %v141_v43 = vpop.f32.mrb[2].mxu1 }
  0xdb   :  { %v142_v44 = vadd.f32 %v1078_v42, %v141_v43  ;;  %v720_v45 = vpop.f32.mrb[3].mxu1  ;;  %v187_v38 = vrot.slane %v170_v29, 2 }
  0xdd   :  { %v171_v53 = vmax.f32 %v142_v44, 0.0 }
  0xde   :  { %v146_v51 = vpop.f32.mrb[4].mxu1 }
  0xdf   :  { %v147_v54 = vadd.f32 %v1078_v42, %v146_v51  ;;  %v723_v55 = vpop.f32.mrb[5].mxu1  ;;  %v180_v0 = vrot.slane %v171_v53, 2 }
  0xe1   :  { %v172_v58 = vmax.f32 %v147_v54, 0.0  ;;  %v188_v48 = vsel %vm179_vm2, %v187_v38, %v180_v0 }
  0xe2   :  { %v151_v62 = vpop.f32.mrb[6].mxu1 }
  0xe3   :  { %v181_v1 = vrot.slane %v172_v58, 2  ;;  %v152_v3 = vadd.f32 %v1078_v42, %v151_v62  ;;  %v726_v4 = vpop.f32.mrb[7].mxu1  ;;  %v204_v16 = vrot.slane %v172_v58, 4 }
  0xe5   :  { %v173_v7 = vmax.f32 %v152_v3, 0.0  ;;  %v182_v8 = vsel %vm179_vm2, %v180_v0, %v181_v1 }
  0xe6   :  { %v156_v14 = vpop.f32.mrb[8].mxu1 }
  0xe7   :  { %v193_v17 = vrot.slane %v173_v7, 2  ;;  %v200_v18 = vrot.slane %v173_v7, 4  ;;  %v157_v19 = vadd.f32 %v1078_v42, %v156_v14  ;;  %v729_v20 = vpop.f32.mrb[9].mxu1  ;;  %v436_v7 = vld [vmem:[%s1262_s5] sm:$0xff]  ;;  %v441_v14 = vld [vmem:[%s1262_s5 + $0x28] sm:$0xff] }
  0xe8   :  { %v838_v15 = vpack.c.bf16 %v441_v14, %v440_v13  ;;  %v445_v20 = vld [vmem:[%s1262_s5 + $0x48] sm:$0xff] }
  0xe9   :  { %v174_v23 = vmax.f32 %v157_v19, 0.0  ;;  %v205_v24 = vsel %vm199_vm3, %v204_v16, %v200_v18  ;;  %v194_v25 = vsel %vm179_vm2, %v181_v1, %v193_v17  ;;  %v442_v16 = vld [vmem:[%s1262_s5 + $0x30] sm:$0xff]  ;;  %v443_v17 = vld [vmem:[%s1262_s5 + $0x38] sm:$0xff]  ;;  %v444_v19 = vld [vmem:[%s1262_s5 + $0x40] sm:$0xff] }
  0xea   :  { %v161_v30 = vpop.f32.mrb[10].mxu1  ;;  %v868_v31 = vpack.i.bf16 %v182_v8, %v205_v24  ;;  %v437_v8 = vld [vmem:[%s1262_s5 + $0x8] sm:$0xff]  ;;  %v844_v21 = vpack.c.bf16 %v445_v20, %v444_v19 }
  0xeb   :  { %v201_v33 = vrot.slane %v174_v23, 4  ;;  %v162_v34 = vadd.f32 %v1078_v42, %v161_v30  ;;  %v732_v35 = vpop.f32.mrb[11].mxu1  ;;  %v223_v40 = vrot.slane %v174_v23, 6  ;;  %v832_v10 = vpack.c.bf16 %v437_v8, %v436_v7  ;;  %v447_v23 = vld [vmem:[%s1262_s5 + $0x58] sm:$0xff] }
  0xec   :  { %869 = vrot.lane.b32.xlu0 %v868_v31, %s910_s27  ;;  %v847_v24 = vpack.c.bf16 %v447_v23, %v446_v22 }
  0xed   :  { %v175_v36 = vmax.f32 %v162_v34, 0.0  ;;  %v202_v37 = vsel %vm199_vm3, %v200_v18, %v201_v33  ;;  %v841_v18 = vpack.c.bf16 %v443_v17, %v442_v16 }
  0xee   :  { %v166_v39 = vpop.f32.mrb[12].mxu1 }
  0xef   :  { %v210_v41 = vrot.slane %v175_v36, 4  ;;  %v217_v43 = vrot.slane %v175_v36, 6  ;;  %v167_v44 = vadd.f32 %v1078_v42, %v166_v39  ;;  %v735_v45 = vpop.f32.mrb[13].mxu1  ;;  %v530_v36 = vld [vmem:[%s1264_s7] sm:$0xff] }
  0xf1   :  { %v176_v46 = vmax.f32 %v167_v44, 0.0  ;;  %v224_v47 = vsel %vm216_vm4, %v223_v40, %v217_v43  ;;  %v211_v49 = vsel %vm199_vm3, %v201_v33, %v210_v41 }
  0xf2   :  { %745 = vmatmul.mubr.msk.f32.vlgmr.msra.gmra.mrb[0].mxu0 %vm225_vm5, %v224_v47  ;;  %v873_v50 = vpack.i.bf16 %v188_v48, %v211_v49 }
  0xf3   :  { %v218_v51 = vrot.slane %v176_v46, 6  ;;  %779 = vmatprep.mubr.msk.f32.mxu0 %vm908_vm1, %v907_v2  ;;  %833 = vmatpush3.bf16.msra.mxu0 %v832_v10 }
  0xf4   :  { %874 = vrot.lane.b32.xlu0 %v873_v50, %s911_s3  ;;  %834 = vmatprep.subr.bf16.mxu0 %v909_v12 }
  0xf5   :  { %v219_v42 = vsel %vm216_vm4, %v217_v43, %v218_v51  ;;  %v533_v51 = vld [vmem:[%s1264_s7 + $0x18] sm:$0xff] }
  0xf6   :  { %v878_v52 = vpack.i.bf16 %v194_v25, %v219_v42  ;;  %v448_v25 = vld [vmem:[%s1262_s5 + $0x60] sm:$0xff] }
  0xf7   :  { %v850_v27 = vpack.c.bf16 %v449_v26, %v448_v25 }
  0xf8   :  { %879 = vrot.lane.b32.xlu1 %v878_v52, %s912_s28  ;;  %v640_v52 = vld [vmem:[%s1263_s6] ss:$0 sm:$0xff] }
 0x15e   :  { %v870_v53 = vpop.permute.xlu0 %869 }
 0x15f   :  { %v872_v55 = vunpack.i.h.bf16 %v870_v53  ;;  %v871_v56 = vunpack.i.l.bf16 %v870_v53 }
 0x161   :  { %v226_v60 = vsel %vm225_vm5, %v170_v29, %v872_v55  ;;  %v231_v63 = vsel %vm225_vm5, %v202_v37, %v871_v56  ;;  %v451_v29 = vld [vmem:[%s1262_s5 + $0x78] sm:$0xff]  ;;  %v531_v37 = vld [vmem:[%s1264_s7 + $0x8] sm:$0xff] }
 0x162   :  { %v853_v30 = vpack.c.bf16 %v451_v29, %v450_v28  ;;  %v856_v38 = vpack.c.bf16 %v531_v37, %v530_v36 }
 0x166   :  { %v875_v54 = vpop.permute.xlu0 %874 }
 0x167   :  { %v877_v57 = vunpack.i.h.bf16 %v875_v54  ;;  %v876_v58 = vunpack.i.l.bf16 %v875_v54 }
 0x169   :  { %v228_v0 = vsel %vm227_vm6, %v226_v60, %v877_v57  ;;  %v232_v1 = vsel %vm227_vm6, %v231_v63, %v876_v58  ;;  %v641_v57 = vld [vmem:[%s1265_s8] ss:$0 sm:$0xff] }
 0x16a   :  { %v880_v59 = vpop.permute.xlu1 %879 }
 0x16b   :  { %v882_v61 = vunpack.i.h.bf16 %v880_v59  ;;  %v881_v62 = vunpack.i.l.bf16 %v880_v59 }
 0x16d   :  { %v233_v3 = vsel %vm229_vm7, %v232_v1, %v881_v62  ;;  %v230_v4 = vsel %vm229_vm7, %v228_v0, %v882_v61 }
 0x16e   :  { %343 = vmatprep.mubr.f32.mxu1 %v233_v3 }
 0x16f   :  { %344 = vmatmul.mubr.f32.vlgmr.msra.gmra.mrb[14].mxu1 %v230_v4 }
 0x170   :  { %790 = vmatprep.mubr.msk.f32.mxu1 %vm908_vm1, %v907_v2  ;;  %v835_v2 = vpack.c.bf16 %v439_v11, %v438_v9  ;;  %857 = vmatpush3.bf16.msra.mxu1 %v856_v38 }
 0x171   :  { %858 = vmatprep.subr.bf16.mxu1 %v909_v12 }
 0x172   :  { %836 = vmatpush3.bf16.msra.mxu0 %v835_v2 }
 0x173   :  { %837 = vmatprep.subr.bf16.mxu0 %v909_v12 }
 0x176   :  { %839 = vmatpush3.bf16.msra.mxu0 %v838_v15 }
 0x177   :  { %840 = vmatprep.subr.bf16.mxu0 %v909_v12 }
 0x17a   :  { %842 = vmatpush3.bf16.msra.mxu0 %v841_v18 }
 0x17b   :  { %843 = vmatprep.subr.bf16.mxu0 %v909_v12 }
 0x17e   :  { %845 = vmatpush3.bf16.msra.mxu0 %v844_v21 }
 0x17f   :  { %846 = vmatprep.subr.bf16.mxu0 %v909_v12 }
 0x182   :  { %848 = vmatpush3.bf16.msra.mxu0 %v847_v24 }
 0x183   :  { %849 = vmatprep.subr.bf16.mxu0 %v909_v12 }
 0x186   :  { %851 = vmatpush3.bf16.msra.mxu0 %v850_v27 }
 0x187   :  { %852 = vmatprep.subr.bf16.mxu0 %v909_v12  ;;  %v532_v12 = vld [vmem:[%s1264_s7 + $0x10] sm:$0xff]  ;;  %s883_s7 = scalar_lea.vmem %s623_s26, 32 }
 0x188   :  { %v859_v42 = vpack.c.bf16 %v533_v51, %v532_v12  ;;  %p884_p0 = scmp.ne.s32.totalorder %s623_s26, %s883_s7  ;;  %p889_p2 = scmp.lt.s32.totalorder %s883_s7, %s883_s7 }
 0x18a   :  { %854 = vmatpush3.bf16.msra.mxu0 %v853_v30  ;;  %860 = vmatpush3.bf16.msra.mxu1 %v859_v42  ;;  %p890_p3 = por %p889_p2, %p888_p1 }
 0x18c   :  { %p891_p4 = pnand %p890_p3, %p884_p0 }
 0x1c5   :  { %v415_v5 = vpop.f32.mrb[0].mxu0 }
 0x1c6   :  { %v746_v6 = vpop.f32.mrb[1].mxu0 }
 0x242   :  { %v683_v31 = vpop.f32.mrb[14].mxu1 }
 0x243   :  { %v684_v33 = vpop.f32.mrb[15].mxu1 }
 0x244   :  { %v685_v34 = vadd.f32 %v684_v33, %v683_v31 }
 0x246   :  { %v346_v35 = vadd.f32 %v685_v34, %v638_v32 }
 0x248   :  { %v416_v39 = vadd.f32 %v415_v5, %v346_v35 }
 0x24a   :  { %v419_v40 = vmax.f32 %v416_v39, 0.0 }
 0x24c   :  { %v425_v41 = vrot.slane %v419_v40, 4  ;;  %v421_v43 = vrot.slane %v419_v40, 2  ;;  %v429_v44 = vrot.slane %v419_v40, 6 }
 0x24e   :  { %426 = vrot.lane.b32.xlu0 %v425_v41, %s911_s3  ;;  %422 = vrot.lane.b32.xlu1 %v421_v43, %s910_s27 }
 0x252   :  { %430 = vrot.lane.b32.xlu1 %v429_v44, %s912_s28 }
 0x2c0   :  { %v423_v45 = vpop.permute.xlu1 %422  ;;  %v427_v46 = vpop.permute.xlu0 %426 }
 0x2c1   :  { %v433_v47 = vsel %vm225_vm5, %v419_v40, %v423_v45 }
 0x2c2   :  { %v434_v48 = vsel %vm227_vm6, %v433_v47, %v427_v46 }
 0x2c4   :  { %v431_v49 = vpop.permute.xlu1 %430 }
 0x2c5   :  { %v435_v50 = vsel %vm229_vm7, %v434_v48, %v431_v49 }
 0x2c6   :  { %780 = vmatmul.mubr.f32.vlgmr.msra.gmra.mrb[2].mxu0 %v435_v50 }
 0x399   :  { %v525_v53 = vpop.f32.mrb[2].mxu0 }
 0x39a   :  { %v526_v54 = vadd.f32 %v640_v52, %v525_v53  ;;  %v781_v55 = vpop.f32.mrb[3].mxu0 }
 0x39c   :  { %v529_v56 = vmax.f32 %v526_v54, 0.0 }
 0x39e   :  { %791 = vmatmul.mubr.msk.f32.vlgmr.msra.gmra.mrb[16].mxu1 %vm225_vm5, %v529_v56 }
 0x471   :  { %v610_v58 = vpop.f32.mrb[16].mxu1 }
 0x472   :  { %v611_v59 = vadd.f32 %v641_v57, %v610_v58  ;;  %v792_v60 = vpop.f32.mrb[17].mxu1 }
 0x474   :  { %615 = vst.msk [vmem:[#allocation2] sm:$0x3] %vm614_vm8, %v611_v59 }
 0x475   :  { %894 = shalt.err (!%p891_p4)
}
 0x476   :  { %s895_s29 = scalar_lea.hbm %s1266_s9, 32 }
 0x477   :  { %p896_p5 = scmp.ne.s32.totalorder %s1266_s9, %s895_s29  ;;  %p899_p6 = scmp.lt.u32.totalorder %s895_s29, %s1266_s9 }
 0x479   :  { %p901_p7 = pnand %p899_p6, %p896_p5 }
 0x47b   :  { %904 = shalt.err (!%p901_p7)
}
 0x47c   :  { %625 = dma.vmem_to_hbm [thread:$0]  %s623_s26, 32, %s1266_s9, [#allocation3]  }
 0x47d   :  { %905 = dma.done.wait [#allocation3], 32  }
 0x47e   :  { %906 = vsyncadd [#allocation3], 4294967264 }
 0x47f   :  { %629 = vsyncpa [#allocation3], 1 }

</bundles_post_ra>
